<compile_context>
chip_gen: v7x
topology: tpu7x:2x2x1
jax: 0.10.0
libtpu: 0.0.40
codegen_flags: <defaults>
</compile_context>

<pallas_src>
import functools

import jax
import jax.numpy as jnp
from jax.experimental import pallas as pl
from jax.experimental.pallas import tpu as pltpu

_LANES = 128
_PAD_LOGIT = -1.0e4  # exp(-|pad|) underflows to 0 -> pad elements add exactly 0.


def _cdiv(a, b):
    return -(-a // b)


def _round_up(a, b):
    return _cdiv(a, b) * b


def _bce_with_logits(x, labels, labels_are_binary):
    """Numerically stable elementwise BCE-with-logits (same formula as torch):
       l(x, y) = max(x, 0) - x*y + log1p(exp(-|x|))."""
    x = x.astype(jnp.float32)
    if labels_are_binary:
        # {0,1} labels: compare+select instead of int8->f32 convert + multiply.
        xy = jnp.where(labels != 0, x, 0.0)
    else:
        xy = x * labels.astype(jnp.float32)
    return jnp.maximum(x, 0.0) - xy + jnp.log1p(jnp.exp(-jnp.abs(x)))


def _hard_log_loss_kernel(logits_ref, labels_ref, out_ref, acc_ref, *, labels_are_binary):
    step = pl.program_id(1)
    num_steps = pl.num_programs(1)

    @pl.when(step == 0)
    def _init():
        acc_ref[...] = jnp.zeros_like(acc_ref)

    # Pure VPU/EUP hot loop: no masks, no iotas, no cross-lane work per step.
    acc_ref[...] += _bce_with_logits(
        logits_ref[...], labels_ref[...], labels_are_binary
    )

    @pl.when(step == num_steps - 1)
    def _finish():
        # Single XLU reduction per split; partial sums land in SMEM.
        out_ref[0, 0] = jnp.sum(acc_ref[...])


def hard_log_loss(logits, labels, *, tile_rows=2048, num_splits=1):
    """Pallas implementation of HardLogLoss.forward (identity hard-sample selection).

    num_splits is a "parallel" leading grid axis: keep 1 on single-TensorCore
    chips (v5e / v6e), set 2 on v7x so each core takes half of the rows.
    """
    assert logits.shape == labels.shape and logits.ndim == 2
    B, C = logits.shape
    total = B * C
    assert total > 0

    labels_are_binary = not jnp.issubdtype(labels.dtype, jnp.floating)

    flat_x = logits.reshape(-1)
    flat_y = labels.reshape(-1)

    if total % _LANES == 0:
        # Common case: free bitcast-reshape into a lane-dense slab, no HBM copy.
        rows = total // _LANES
        x2d = flat_x.reshape(rows, _LANES)
        y2d = flat_y.reshape(rows, _LANES)
    else:
        # Ragged fallback (B*C not a multiple of 128): pad to a 32-sublane-aligned
        # slab.  Logits padded with a large negative value, labels with 0, so each
        # pad element contributes exactly 0 -> no mask / correction needed.
        rows = _round_up(_cdiv(total, _LANES), 32)
        pad = rows * _LANES - total
        x2d = jnp.pad(flat_x, (0, pad), constant_values=_PAD_LOGIT).reshape(rows, _LANES)
        y2d = jnp.pad(flat_y, (0, pad)).reshape(rows, _LANES)

    # Row tiling: (tb, 128) blocks; tb is a multiple of 32 (int8/bf16 sublane
    # packing) unless a single block covers the whole slab.
    if rows <= tile_rows:
        tb = rows
    else:
        tb = _round_up(tile_rows, 32)

    blocks_total = rows // tb
    num_splits = max(1, min(num_splits, blocks_total))
    steps = blocks_total // num_splits
    blocks_kernel = steps * num_splits
    rows_kernel = blocks_kernel * tb

    kernel = functools.partial(
        _hard_log_loss_kernel, labels_are_binary=labels_are_binary
    )

    elems = rows_kernel * _LANES
    bytes_accessed = elems * (
        jnp.dtype(logits.dtype).itemsize + jnp.dtype(labels.dtype).itemsize
    ) + num_splits * 4
    cost = pl.CostEstimate(
        flops=7 * elems, transcendentals=2 * elems, bytes_accessed=bytes_accessed
    )

    partials = pl.pallas_call(
        kernel,
        out_shape=jax.ShapeDtypeStruct((num_splits, 1), jnp.float32),
        grid=(num_splits, steps),
        in_specs=[
            pl.BlockSpec((tb, _LANES), lambda s, i: (s * steps + i, 0)),
            pl.BlockSpec((tb, _LANES), lambda s, i: (s * steps + i, 0)),
        ],
        out_specs=pl.BlockSpec(
            (1, 1), lambda s, i: (s, 0), memory_space=pltpu.MemorySpace.SMEM
        ),
        scratch_shapes=[pltpu.VMEM((tb, _LANES), jnp.float32)],
        compiler_params=pltpu.CompilerParams(
            dimension_semantics=("parallel", "arbitrary"),
            vmem_limit_bytes=32 << 20,
        ),
        cost_estimate=cost,
    )(x2d, y2d)

    grand = jnp.sum(partials)

    # Rows that don't fill whole (tb, 128) blocks: tiny jnp epilogue on the tail
    # slice (< tb*num_splits rows) instead of padding / re-copying the slab.
    if rows_kernel < rows:
        grand = grand + jnp.sum(
            _bce_with_logits(x2d[rows_kernel:], y2d[rows_kernel:], labels_are_binary)
        )

    # Identity hard-sample selection keeps all B samples in every class, so the
    # per-class-mean-then-class-mean equals the global mean over B*C elements.
    return grand / total


def _reference_loss(logits, labels):
    # Mirrors the PyTorch module: per-class BCEWithLogitsLoss means, then mean
    # over the classes.
    x = logits.astype(jnp.float32)
    y = labels.astype(jnp.float32)
    per_elem = jnp.maximum(x, 0.0) - x * y + jnp.log1p(jnp.exp(-jnp.abs(x)))
    per_class = jnp.mean(per_elem, axis=0)
    return jnp.mean(per_class)


if __name__ == "__main__":
    NUM_CLASSES = 28  # HPA protein task class count
    key = jax.random.PRNGKey(0)
    k1, k2, k3, k4 = jax.random.split(key, 4)

    # Case 1: B*C divisible by 128 -> zero-copy reshape path, int8 labels.
    B1 = 32
    logits1 = jax.random.normal(k1, (B1, NUM_CLASSES), dtype=jnp.float32)
    labels1 = jax.random.bernoulli(k2, 0.3, (B1, NUM_CLASSES)).astype(jnp.int8)
    loss1 = jax.block_until_ready(hard_log_loss(logits1, labels1))
    ref1 = _reference_loss(logits1, labels1)
    assert jnp.allclose(loss1, ref1, rtol=1e-5, atol=1e-5), (loss1, ref1)

    # Case 2: ragged B*C (not a multiple of 128) -> padded fallback, float labels.
    B2 = 16
    logits2 = jax.random.normal(k3, (B2, NUM_CLASSES), dtype=jnp.float32)
    labels2 = jax.random.bernoulli(k4, 0.3, (B2, NUM_CLASSES)).astype(jnp.float32)
    loss2 = jax.block_until_ready(hard_log_loss(logits2, labels2))
    ref2 = _reference_loss(logits2, labels2)
    assert jnp.allclose(loss2, ref2, rtol=1e-5, atol=1e-5), (loss2, ref2)

    print("KERNEL_OK")
</pallas_src>

<mosaic_0001>
module attributes {stable_mosaic.version = 11 : i64} {
  func.func @_hard_log_loss_kernel(%arg0: i32, %arg1: i32, %arg2: memref<7x128xf32, #tpu.memory_space<vmem>>, %arg3: memref<7x128xi8, #tpu.memory_space<vmem>>, %arg4: memref<1x1xf32, #tpu.memory_space<smem>>, %arg5: memref<7x128xf32, #tpu.memory_space<vmem>>) attributes {dimension_semantics = [#tpu.dimension_semantics<parallel>, #tpu.dimension_semantics<arbitrary>], iteration_bounds = array<i64: 1, 1>, scalar_prefetch = 0 : i64, scratch_operands = 1 : i64, tpu.core_type = #tpu.core_type<tc>, window_params = [{transform_indices = @transform_0, window_bounds = array<i64: 7, 128>}, {transform_indices = @transform_1, window_bounds = array<i64: 7, 128>}, {transform_indices = @transform_2, window_bounds = array<i64: 1, 1>}]} {
    %c0_i32 = arith.constant 0 : i32
    %0 = arith.cmpi eq, %arg1, %c0_i32 : i32
    %1 = arith.extui %0 : i1 to i32
    %c0_i32_0 = arith.constant 0 : i32
    %2 = arith.cmpi ne, %1, %c0_i32_0 : i32
    scf.if %2 {
      %cst_12 = arith.constant 0.000000e+00 : f32
      %24 = vector.broadcast %cst_12 : f32 to vector<7x128xf32>
      %c0_13 = arith.constant 0 : index
      %c0_14 = arith.constant 0 : index
      %25 = vector.load %arg5[%c0_13, %c0_14] : memref<7x128xf32, #tpu.memory_space<vmem>>, vector<7x128xf32>
      tpu.vector_store %arg5[%c0_13, %c0_14], %24 {strides = array<i32>} : memref<7x128xf32, #tpu.memory_space<vmem>>, vector<7x128xf32>,
    } else {
    }
    %c0 = arith.constant 0 : index
    %c0_1 = arith.constant 0 : index
    %3 = vector.load %arg5[%c0, %c0_1] : memref<7x128xf32, #tpu.memory_space<vmem>>, vector<7x128xf32>
    %c0_2 = arith.constant 0 : index
    %c0_3 = arith.constant 0 : index
    %4 = vector.load %arg2[%c0_2, %c0_3] : memref<7x128xf32, #tpu.memory_space<vmem>>, vector<7x128xf32>
    %c0_4 = arith.constant 0 : index
    %c0_5 = arith.constant 0 : index
    %5 = vector.load %arg3[%c0_4, %c0_5] : memref<7x128xi8, #tpu.memory_space<vmem>>, vector<7x128xi8>
    %c0_i8 = arith.constant 0 : i8
    %6 = vector.broadcast %c0_i8 : i8 to vector<7x128xi8>
    %7 = arith.cmpi ne, %5, %6 : vector<7x128xi8>
    %cst = arith.constant 0.000000e+00 : f32
    %8 = vector.broadcast %cst : f32 to vector<7x128xf32>
    %9 = arith.select %7, %4, %8 : vector<7x128xi1>, vector<7x128xf32>
    %cst_6 = arith.constant 0.000000e+00 : f32
    %10 = vector.broadcast %cst_6 : f32 to vector<7x128xf32>
    %11 = arith.maximumf %4, %10 : vector<7x128xf32>
    %12 = arith.subf %11, %9 : vector<7x128xf32>
    %13 = math.absf %4 : vector<7x128xf32>
    %cst_7 = arith.constant 0.000000e+00 : f32
    %14 = vector.broadcast %cst_7 : f32 to vector<7x128xf32>
    %15 = arith.subf %14, %13 : vector<7x128xf32>
    %16 = math.exp %15 : vector<7x128xf32>
    %17 = math.log1p %16 : vector<7x128xf32>
    %18 = arith.addf %12, %17 : vector<7x128xf32>
    %19 = arith.addf %3, %18 : vector<7x128xf32>
    %c0_8 = arith.constant 0 : index
    %c0_9 = arith.constant 0 : index
    %20 = vector.load %arg5[%c0_8, %c0_9] : memref<7x128xf32, #tpu.memory_space<vmem>>, vector<7x128xf32>
    tpu.vector_store %arg5[%c0_8, %c0_9], %19 {strides = array<i32>} : memref<7x128xf32, #tpu.memory_space<vmem>>, vector<7x128xf32>,
    %c0_i32_10 = arith.constant 0 : i32
    %21 = arith.cmpi eq, %arg1, %c0_i32_10 : i32
    %22 = arith.extui %21 : i1 to i32
    %c0_i32_11 = arith.constant 0 : i32
    %23 = arith.cmpi ne, %22, %c0_i32_11 : i32
    scf.if %23 {
      %c0_12 = arith.constant 0 : index
      %c0_13 = arith.constant 0 : index
      %24 = vector.load %arg5[%c0_12, %c0_13] : memref<7x128xf32, #tpu.memory_space<vmem>>, vector<7x128xf32>
      %25 = vector.shape_cast %24 : vector<7x128xf32> to vector<1x7x128xf32>
      %cst_14 = arith.constant dense<0.000000e+00> : vector<1xf32>
      %26 = vector.multi_reduction <add>, %25, %cst_14 [1, 2] : vector<1x7x128xf32> to vector<1xf32>
      %27 = vector.shape_cast %26 : vector<1xf32> to vector<1x1x1xf32>
      %28 = vector.extract %27[0, 0, 0] : f32 from vector<1x1x1xf32>
      %c0_15 = arith.constant 0 : index
      %c0_16 = arith.constant 0 : index
      %29 = memref.load %arg4[%c0_15, %c0_16] : memref<1x1xf32, #tpu.memory_space<smem>>
      memref.store %28, %arg4[%c0_15, %c0_16] : memref<1x1xf32, #tpu.memory_space<smem>>
    } else {
    }
    return
  }
  func.func @transform_0(%arg0: i32, %arg1: i32) -> (i32, i32) {
    %c1_i32 = arith.constant 1 : i32
    %0 = arith.muli %arg0, %c1_i32 : i32
    %1 = arith.addi %0, %arg1 : i32
    %c0_i32 = arith.constant 0 : i32
    %c0_i32_0 = arith.constant 0 : i32
    return %1, %c0_i32 : i32, i32
  }
  func.func @transform_1(%arg0: i32, %arg1: i32) -> (i32, i32) {
    %c1_i32 = arith.constant 1 : i32
    %0 = arith.muli %arg0, %c1_i32 : i32
    %1 = arith.addi %0, %arg1 : i32
    %c0_i32 = arith.constant 0 : i32
    %c0_i32_0 = arith.constant 0 : i32
    return %1, %c0_i32 : i32, i32
  }
  func.func @transform_2(%arg0: i32, %arg1: i32) -> (i32, i32) {
    %c0_i32 = arith.constant 0 : i32
    %c0_i32_0 = arith.constant 0 : i32
    return %arg0, %c0_i32 : i32, i32
  }
}

</mosaic_0001>

<bundles_post_ra>
// kernel: tpu_custom_call.1
= control target key start
LH: loop header
LB: loop body
LE: loop exit
PB: predicated region body
PF: predicated region fallthrough
CT: control target
= control target key end

     0   :  { %7 = vsyncpa [#allocation4], 0  ;;  %s207_s0 = inlined_call_operand.hbm [shape: f32[7,128], index: 0, kind: input, shape index: {}]   ;;  %s208_s1 = inlined_call_operand.vmem [shape: s8[7,128], index: 1, kind: input, shape index: {}]   ;;  %s209_s2 = inlined_call_operand.hbm [shape: f32[1,1], index: 2, kind: output, shape index: {}]  }
   0x1   :  { %8 = vsyncpa [#allocation5], 0  ;;  %s161_s9 = smov [#allocation3]   ;;  %s125_s13 = scalar_lea.hbm %s207_s0, 128 }
   0x2   :  { %s18_s10 = sshll.u32 %s161_s9, 4  ;;  %p126_p0 = scmp.ne.s32.totalorder %s207_s0, %s125_s13  ;;  %s19_s10 = int_to_ptr.vmem [resolvable:$true] %s18_s10 }
   0x3   :  { %p129_p1 = scmp.lt.u32.totalorder %s125_s13, %s207_s0 }
   0x5   :  { %p131_p2 = pnand %p129_p1, %p126_p0 }
   0x7   :  { %134 = shalt.err (!%p131_p2)
}
   0x8   :  { %s135_s18 = scalar_lea.vmem %s19_s10, 128  ;;  %p140_p4 = scmp.lt.s32.totalorder %s19_s10, %s19_s10 }
   0x9   :  { %p136_p3 = scmp.ne.s32.totalorder %s19_s10, %s135_s18  ;;  %p141_p5 = scmp.lt.s32.totalorder %s135_s18, %s135_s18 }
   0xb   :  { %p142_p6 = por %p141_p5, %p140_p4 }
   0xd   :  { %p143_p7 = pnand %p142_p6, %p136_p3 }
   0xf   :  { %146 = shalt.err (!%p143_p7)
}
  0x10   :  { %21 = dma.hbm_to_vmem [thread:$0]  %s207_s0, 128, %s19_s10, [#allocation4]  }
  0x11   :  { %157 = dma.done.wait [#allocation4], 128  }
  0x12   :  { %158 = vsyncadd [#allocation4], 4294967168  ;;  %v162_v0 = vmov 0.0   ;;  %v53_v1 = vld [vmem:[#allocation3] sm:$0x7f]  ;;  %v163_v7 = vmov 0  }
  0x13   :  { %51 = vst [vmem:[#allocation2] sm:$0x7f] %v162_v0  ;;  %v62_v2 = vand.u32 2147483647, %v53_v1  ;;  %v54_v5 = vld [vmem:[%s208_s1] sm:$0x3] }
  0x14   :  { %vm55_vm0 = vnez %v54_v5  ;;  %v60_v13 = vmax.f32 %v53_v1, 0.0  ;;  %vm82_vm3 = vcmask 1046528   ;;  %s147_s24 = scalar_lea.hbm %s209_s2, 16 }
  0x15   :  { %v63_v3 = vsub.f32 0.0, %v62_v2  ;;  %v56_v8 = vsel %vm55_vm0, 16843009, %v163_v7  ;;  %p148_p8 = scmp.ne.s32.totalorder %s209_s2, %s147_s24  ;;  %p151_p9 = scmp.lt.u32.totalorder %s147_s24, %s209_s2 }
  0x16   :  { %v57_v10 = vunpack.c.0.s8 %v56_v8 }
  0x17   :  { %v64_v4 = vmul.f32 1.442695, %v63_v3  ;;  %p153_p10 = pnand %p151_p9, %p148_p8 }
  0x18   :  { %vm58_vm1 = vcmp.ne.s32.totalorder %v57_v10, 0 }
  0x19   :  { %121 = vpow2.f32 %v64_v4  ;;  %v59_v15 = vsel %vm58_vm1, %v53_v1, 0.0 }
  0x1a   :  { %v61_v18 = vsub.f32 %v60_v13, %v59_v15  ;;  %v52_v20 = vld [vmem:[#allocation2] sm:$0x7f] }
  0x23   :  { %v122_v6 = vpop.eup %121 }
  0x24   :  { %v66_v9 = vadd.f32 1.0, %v122_v6  ;;  %v69_v11 = vmul.f32 -0.5, %v122_v6  ;;  %v72_v14 = vand.u32 2147483647, %v122_v6 }
  0x26   :  { %123 = vlog2.f32 %v66_v9  ;;  %v70_v12 = vadd.f32 1.0, %v69_v11  ;;  %vm73_vm2 = vcmp.lt.f32.partialorder %v72_v14, 0.0004427343 }
  0x28   :  { %v71_v16 = vmul.f32 %v122_v6, %v70_v12 }
  0x30   :  { %v124_v17 = vpop.eup %123 }
  0x31   :  { %v68_v19 = vmul.f32 0.6931472, %v124_v17 }
  0x33   :  { %v74_v21 = vsel %vm73_vm2, %v71_v16, %v68_v19 }
  0x34   :  { %v75_v22 = vadd.f32 %v74_v21, %v61_v18 }
  0x36   :  { %v76_v23 = vadd.f32 %v75_v22, %v52_v20 }
  0x38   :  { %77 = vst [vmem:[#allocation2] sm:$0x7f] %v76_v23 }
  0x3f   :  { %v81_v24 = vld [vmem:[#allocation2] sm:$0x7f] }
  0x40   :  { %v83_v25 = vsel %vm82_vm3, %v81_v24, 0.0 }
  0x41   :  { %84 = vadd.xlane.f32.xlu0 %v83_v25 }
  0xce   :  { %v85_v26 = vpop.xlane.xlu0 %84 }
  0xcf   :  { %v86_v27 = vrot.slane %v85_v26, 4 }
  0xd1   :  { %v87_v28 = vadd.f32 %v86_v27, %v85_v26 }
  0xd3   :  { %v88_v29 = vrot.slane %v87_v28, 2 }
  0xd5   :  { %v89_v30 = vadd.f32 %v88_v29, %v87_v28 }
  0xd7   :  { %v90_v31 = vrot.slane %v89_v30, 1 }
  0xd9   :  { %v91_v32 = vadd.f32 %v90_v31, %v89_v30 }
  0xdb   :  { %115 = vpush %v91_v32 }
 0x10c   :  { %s116_s0 = spop %115 }
 0x10d   :  { %94 = sst [smem:[#allocation6]] %s116_s0 }
 0x10e   :  { %156 = shalt.err (!%p153_p10)
}
 0x10f   :  { %s164_s29 = smov [#allocation6]  }
 0x110   :  { %102 = dma.smem_to_hbm %s164_s29, 16, %s209_s2, [#allocation5]  }
 0x111   :  { %159 = dma.done.wait [#allocation5], 16  }
 0x112   :  { %160 = vsyncadd [#allocation5], 4294967280 }
 0x113   :  { %106 = sfence }
 0x114   :  { %107 = vsyncpa [#allocation4], 1 }
 0x115   :  { %108 = vsyncpa [#allocation5], 1 }

</bundles_post_ra>
